<compile_context>
chip_gen: v7x
topology: tpu7x:2x2x1
jax: 0.10.0
libtpu: 0.0.40
codegen_flags: <defaults>
</compile_context>

<pallas_src>
import functools

import jax
import jax.numpy as jnp
from jax.experimental import pallas as pl
from jax.experimental.pallas import tpu as pltpu

HIDDEN1 = 64
HIDDEN2 = 32


def _mlp_kernel(x_ref, w1_ref, b1_ref, w2_ref, b2_ref, w3_ref, b3_ref, o_ref):
    # Whole hot path (3 matmuls + ReLU + sigmoid) on one batch tile.
    # MXU operands bf16, accumulation + elementwise epilogue f32.
    x = x_ref[...]
    if x.dtype != jnp.bfloat16:
        x = x.astype(jnp.bfloat16)

    h1 = jnp.dot(x, w1_ref[...], preferred_element_type=jnp.float32) + b1_ref[...]
    h1 = jnp.maximum(h1, 0.0)

    h2 = jnp.dot(h1.astype(jnp.bfloat16), w2_ref[...],
                 preferred_element_type=jnp.float32) + b2_ref[...]
    h2 = jnp.maximum(h2, 0.0)

    logits = jnp.dot(h2.astype(jnp.bfloat16), w3_ref[...],
                     preferred_element_type=jnp.float32) + b3_ref[...]
    o_ref[...] = jax.nn.sigmoid(logits).astype(o_ref.dtype)


def _round_up(v, m):
    return ((v + m - 1) // m) * m


def _vmem_capacity_bytes():
    try:
        return int(pltpu.get_tpu_info().vmem_capacity_bytes)
    except Exception:
        return 64 << 20  # most restrictive generation (v7x) as a safe fallback


def _choose_tile_and_vmem_limit(b, f, c, x_itemsize):
    """Pick a batch tile from the physical VMEM budget of this TPU generation."""
    vmem_cap = _vmem_capacity_bytes()

    # Per-row VMEM footprint of one grid step:
    #   2x double-buffered x block + f32 h1/h2 temporaries + 2x double-buffered out block.
    per_row = 2 * f * x_itemsize + (HIDDEN1 + HIDDEN2) * 4 + 2 * c * 4
    # Resident bf16 weights + f32 biases (double-buffered, tiny).
    fixed = 2 * ((f * HIDDEN1 + HIDDEN1 * HIDDEN2 + HIDDEN2 * c) * 2
                 + (HIDDEN1 + HIDDEN2 + c) * 4)

    # Spend at most ~3/8 of physical VMEM -> ample headroom for compiler temporaries
    # on every generation (incl. v7x's 64 MiB).
    budget = max((vmem_cap * 3) // 8 - fixed, 8 * per_row)
    tile_cap = max(8, (budget // per_row) // 8 * 8)

    b8 = _round_up(b, 8)
    tile = min(tile_cap, b8)

    # For large batches keep >= 2 grid steps so the "parallel" batch axis can shard
    # across v7x's two TensorCores (near-zero effect on single-TC v5e/v6e).
    if b8 >= 2048:
        tile = min(tile, _round_up((b8 + 1) // 2, 8))
    tile = max(8, (tile // 8) * 8)

    needed = tile * per_row + fixed
    vmem_limit = int(min(vmem_cap - (4 << 20), max(2 * needed, 32 << 20)))
    return tile, vmem_limit


@functools.partial(jax.jit, static_argnames=("tile", "vmem_limit_bytes"))
def _forward_impl(x, params, tile, vmem_limit_bytes):
    b, f = x.shape
    c = params["w3"].shape[1]
    grid = (pl.cdiv(b, tile),)  # ragged edge block handled by Pallas (masked writes)

    # Weights/biases: full-array blocks with constant index_maps (fetched once,
    # kept resident across the batch grid).
    full = lambda shape: pl.BlockSpec(shape, lambda i: (0, 0))

    return pl.pallas_call(
        _mlp_kernel,
        out_shape=jax.ShapeDtypeStruct((b, c), jnp.float32),
        grid_spec=pltpu.PrefetchScalarGridSpec(
            num_scalar_prefetch=0,
            grid=grid,
            in_specs=[
                pl.BlockSpec((tile, f), lambda i: (i, 0)),
                full((f, HIDDEN1)),
                full((1, HIDDEN1)),
                full((HIDDEN1, HIDDEN2)),
                full((1, HIDDEN2)),
                full((HIDDEN2, c)),
                full((1, c)),
            ],
            out_specs=pl.BlockSpec((tile, c), lambda i: (i, 0)),
        ),
        compiler_params=pltpu.CompilerParams(
            dimension_semantics=("parallel",),   # batch tiles across TCs on v7x megacore
            vmem_limit_bytes=vmem_limit_bytes,
        ),
    )(x, params["w1"], params["b1"], params["w2"], params["b2"],
      params["w3"], params["b3"])


def tabular_nn_forward(x, params):
    """Forward pass of TabularNN.

    x: [B, input_size] float32 or bfloat16
    params: dict with bf16 w1[in,64], w2[64,32], w3[32,C] and f32 b1/b2/b3 [1,out]
    returns: [B, C] float32 (sigmoid probabilities)
    """
    b, f = x.shape
    c = params["w3"].shape[1]
    tile, vmem_limit = _choose_tile_and_vmem_limit(b, f, c, x.dtype.itemsize)
    return _forward_impl(x, params, tile, vmem_limit)


def init_params(key, input_size, num_classes):
    """Deterministic f32 init matching torch.nn.Linear's U(-1/sqrt(fan_in), 1/sqrt(fan_in))."""
    def linear(k, fan_in, fan_out):
        kw, kb = jax.random.split(k)
        bound = 1.0 / jnp.sqrt(fan_in)
        # stored as [in, out] (transposed relative to torch's [out, in])
        w = jax.random.uniform(kw, (fan_in, fan_out), jnp.float32, -bound, bound)
        b = jax.random.uniform(kb, (1, fan_out), jnp.float32, -bound, bound)
        return w, b

    k1, k2, k3 = jax.random.split(key, 3)
    w1, b1 = linear(k1, input_size, HIDDEN1)
    w2, b2 = linear(k2, HIDDEN1, HIDDEN2)
    w3, b3 = linear(k3, HIDDEN2, num_classes)
    return {"w1": w1, "b1": b1, "w2": w2, "b2": b2, "w3": w3, "b3": b3}


def prepare_inference_params(params_f32):
    """One-time bf16 cast of the weights at load time (biases stay f32)."""
    out = dict(params_f32)
    for k in ("w1", "w2", "w3"):
        out[k] = params_f32[k].astype(jnp.bfloat16)
    return out


def reference_forward(x, p):
    # Pure-JAX f32 reference of the original PyTorch forward.
    h1 = jnp.maximum(x @ p["w1"] + p["b1"], 0.0)
    h2 = jnp.maximum(h1 @ p["w2"] + p["b2"], 0.0)
    return jax.nn.sigmoid(h2 @ p["w3"] + p["b3"])


if __name__ == "__main__":
    key = jax.random.PRNGKey(0)
    k_x, k_p = jax.random.split(key)

    batch = 8
    input_size = 16
    num_classes = 3

    x = jax.random.normal(k_x, (batch, input_size), jnp.float32)
    params_f32 = init_params(k_p, input_size, num_classes)
    params = prepare_inference_params(params_f32)   # bf16 weights, cast once at load time

    out = tabular_nn_forward(x, params)
    out = jax.block_until_ready(out)

    ref = reference_forward(x, params_f32)
    assert out.shape == (batch, num_classes)
    # bf16 MXU operands => loosened tolerance vs the f32 reference (sigmoid outputs in [0,1]).
    assert jnp.allclose(out, ref, atol=3e-2, rtol=3e-2), "mismatch vs pure-JAX reference"
    assert bool(jnp.all(jnp.isfinite(out)))

    # Exercise a larger batch that is NOT a multiple of the tile: covers the ragged
    # edge-block path (no jnp.pad) and the >=2-grid-step megacore split.
    big_batch = 2072
    xb = jax.random.normal(k_x, (big_batch, input_size), jnp.float32)
    outb = jax.block_until_ready(tabular_nn_forward(xb, params))
    refb = reference_forward(xb, params_f32)
    assert outb.shape == (big_batch, num_classes)
    assert jnp.allclose(outb, refb, atol=3e-2, rtol=3e-2), "mismatch on large ragged batch"
    assert bool(jnp.all(jnp.isfinite(outb)))

    print("KERNEL_OK")
</pallas_src>

<mosaic_0001>
module attributes {stable_mosaic.version = 11 : i64} {
  func.func @_mlp_kernel(%arg0: i32, %arg1: memref<8x16xf32, #tpu.memory_space<vmem>>, %arg2: memref<16x64xbf16, #tpu.memory_space<vmem>>, %arg3: memref<1x64xf32, #tpu.memory_space<vmem>>, %arg4: memref<64x32xbf16, #tpu.memory_space<vmem>>, %arg5: memref<1x32xf32, #tpu.memory_space<vmem>>, %arg6: memref<32x3xbf16, #tpu.memory_space<vmem>>, %arg7: memref<1x3xf32, #tpu.memory_space<vmem>>, %arg8: memref<8x3xf32, #tpu.memory_space<vmem>>) attributes {dimension_semantics = [#tpu.dimension_semantics<parallel>], iteration_bounds = array<i64: 1>, scalar_prefetch = 0 : i64, scratch_operands = 0 : i64, tpu.core_type = #tpu.core_type<tc>, window_params = [{transform_indices = @transform_0, window_bounds = array<i64: 8, 16>}, {pipeline_mode = #tpu.pipeline_mode<synchronous>, transform_indices = @transform_1, window_bounds = array<i64: 16, 64>}, {pipeline_mode = #tpu.pipeline_mode<synchronous>, transform_indices = @transform_2, window_bounds = array<i64: 1, 64>}, {pipeline_mode = #tpu.pipeline_mode<synchronous>, transform_indices = @transform_3, window_bounds = array<i64: 64, 32>}, {pipeline_mode = #tpu.pipeline_mode<synchronous>, transform_indices = @transform_4, window_bounds = array<i64: 1, 32>}, {pipeline_mode = #tpu.pipeline_mode<synchronous>, transform_indices = @transform_5, window_bounds = array<i64: 32, 3>}, {pipeline_mode = #tpu.pipeline_mode<synchronous>, transform_indices = @transform_6, window_bounds = array<i64: 1, 3>}, {transform_indices = @transform_7, window_bounds = array<i64: 8, 3>}]} {
    %c0 = arith.constant 0 : index
    %c0_0 = arith.constant 0 : index
    %0 = vector.load %arg1[%c0, %c0_0] : memref<8x16xf32, #tpu.memory_space<vmem>>, vector<8x16xf32>
    %1 = arith.truncf %0 : vector<8x16xf32> to vector<8x16xbf16>
    %c0_1 = arith.constant 0 : index
    %c0_2 = arith.constant 0 : index
    %2 = vector.load %arg2[%c0_1, %c0_2] : memref<16x64xbf16, #tpu.memory_space<vmem>>, vector<16x64xbf16>
    %cst = arith.constant dense<0.000000e+00> : vector<8x64xf32>
    %3 = tpu.matmul %1, %2, %cst {dimension_numbers = #tpu.dot_dimension_numbers<[1], [0], [0], [1], [0, 0, 1, 1], [], []>} : vector<8x16xbf16>, vector<16x64xbf16>, vector<8x64xf32> -> vector<8x64xf32>
    %c0_3 = arith.constant 0 : index
    %c0_4 = arith.constant 0 : index
    %4 = vector.load %arg3[%c0_3, %c0_4] : memref<1x64xf32, #tpu.memory_space<vmem>>, vector<1x64xf32>
    %5 = vector.broadcast %4 : vector<1x64xf32> to vector<8x64xf32>
    %6 = arith.addf %3, %5 : vector<8x64xf32>
    %cst_5 = arith.constant 0.000000e+00 : f32
    %7 = vector.broadcast %cst_5 : f32 to vector<8x64xf32>
    %8 = arith.maximumf %6, %7 : vector<8x64xf32>
    %9 = arith.truncf %8 : vector<8x64xf32> to vector<8x64xbf16>
    %c0_6 = arith.constant 0 : index
    %c0_7 = arith.constant 0 : index
    %10 = vector.load %arg4[%c0_6, %c0_7] : memref<64x32xbf16, #tpu.memory_space<vmem>>, vector<64x32xbf16>
    %cst_8 = arith.constant dense<0.000000e+00> : vector<8x32xf32>
    %11 = tpu.matmul %9, %10, %cst_8 {dimension_numbers = #tpu.dot_dimension_numbers<[1], [0], [0], [1], [0, 0, 1, 1], [], []>} : vector<8x64xbf16>, vector<64x32xbf16>, vector<8x32xf32> -> vector<8x32xf32>
    %c0_9 = arith.constant 0 : index
    %c0_10 = arith.constant 0 : index
    %12 = vector.load %arg5[%c0_9, %c0_10] : memref<1x32xf32, #tpu.memory_space<vmem>>, vector<1x32xf32>
    %13 = vector.broadcast %12 : vector<1x32xf32> to vector<8x32xf32>
    %14 = arith.addf %11, %13 : vector<8x32xf32>
    %cst_11 = arith.constant 0.000000e+00 : f32
    %15 = vector.broadcast %cst_11 : f32 to vector<8x32xf32>
    %16 = arith.maximumf %14, %15 : vector<8x32xf32>
    %17 = arith.truncf %16 : vector<8x32xf32> to vector<8x32xbf16>
    %c0_12 = arith.constant 0 : index
    %c0_13 = arith.constant 0 : index
    %18 = vector.load %arg6[%c0_12, %c0_13] : memref<32x3xbf16, #tpu.memory_space<vmem>>, vector<32x3xbf16>
    %cst_14 = arith.constant dense<0.000000e+00> : vector<8x3xf32>
    %19 = tpu.matmul %17, %18, %cst_14 {dimension_numbers = #tpu.dot_dimension_numbers<[1], [0], [0], [1], [0, 0, 1, 1], [], []>} : vector<8x32xbf16>, vector<32x3xbf16>, vector<8x3xf32> -> vector<8x3xf32>
    %c0_15 = arith.constant 0 : index
    %c0_16 = arith.constant 0 : index
    %20 = vector.load %arg7[%c0_15, %c0_16] : memref<1x3xf32, #tpu.memory_space<vmem>>, vector<1x3xf32>
    %21 = vector.broadcast %20 : vector<1x3xf32> to vector<8x3xf32>
    %22 = arith.addf %19, %21 : vector<8x3xf32>
    %23 = arith.negf %22 : vector<8x3xf32>
    %24 = math.exp %23 : vector<8x3xf32>
    %cst_17 = arith.constant 1.000000e+00 : f32
    %25 = vector.broadcast %cst_17 : f32 to vector<8x3xf32>
    %26 = arith.addf %25, %24 : vector<8x3xf32>
    %27 = arith.divf %25, %26 : vector<8x3xf32>
    %c0_18 = arith.constant 0 : index
    %c0_19 = arith.constant 0 : index
    %28 = vector.load %arg8[%c0_18, %c0_19] : memref<8x3xf32, #tpu.memory_space<vmem>>, vector<8x3xf32>
    tpu.vector_store %arg8[%c0_18, %c0_19], %27 {strides = array<i32>} : memref<8x3xf32, #tpu.memory_space<vmem>>, vector<8x3xf32>,
    return
  }
  func.func @transform_0(%arg0: i32) -> (i32, i32) {
    %c0_i32 = arith.constant 0 : i32
    %c0_i32_0 = arith.constant 0 : i32
    return %arg0, %c0_i32 : i32, i32
  }
  func.func @transform_1(%arg0: i32) -> (i32, i32) {
    %c0_i32 = arith.constant 0 : i32
    %c0_i32_0 = arith.constant 0 : i32
    %c0_i32_1 = arith.constant 0 : i32
    return %c0_i32, %c0_i32_0 : i32, i32
  }
  func.func @transform_2(%arg0: i32) -> (i32, i32) {
    %c0_i32 = arith.constant 0 : i32
    %c0_i32_0 = arith.constant 0 : i32
    %c0_i32_1 = arith.constant 0 : i32
    return %c0_i32, %c0_i32_0 : i32, i32
  }
  func.func @transform_3(%arg0: i32) -> (i32, i32) {
    %c0_i32 = arith.constant 0 : i32
    %c0_i32_0 = arith.constant 0 : i32
    %c0_i32_1 = arith.constant 0 : i32
    return %c0_i32, %c0_i32_0 : i32, i32
  }
  func.func @transform_4(%arg0: i32) -> (i32, i32) {
    %c0_i32 = arith.constant 0 : i32
    %c0_i32_0 = arith.constant 0 : i32
    %c0_i32_1 = arith.constant 0 : i32
    return %c0_i32, %c0_i32_0 : i32, i32
  }
  func.func @transform_5(%arg0: i32) -> (i32, i32) {
    %c0_i32 = arith.constant 0 : i32
    %c0_i32_0 = arith.constant 0 : i32
    %c0_i32_1 = arith.constant 0 : i32
    return %c0_i32, %c0_i32_0 : i32, i32
  }
  func.func @transform_6(%arg0: i32) -> (i32, i32) {
    %c0_i32 = arith.constant 0 : i32
    %c0_i32_0 = arith.constant 0 : i32
    %c0_i32_1 = arith.constant 0 : i32
    return %c0_i32, %c0_i32_0 : i32, i32
  }
  func.func @transform_7(%arg0: i32) -> (i32, i32) {
    %c0_i32 = arith.constant 0 : i32
    %c0_i32_0 = arith.constant 0 : i32
    return %arg0, %c0_i32 : i32, i32
  }
}

</mosaic_0001>

<bundles_post_ra>
// kernel: _forward_impl.1
= control target key start
LH: loop header
LB: loop body
LE: loop exit
PB: predicated region body
PF: predicated region fallthrough
CT: control target
= control target key end

     0   :  { %v317_v0 = vmov 0.0   ;;  %vm318_vm0 = vmmov 0   ;;  %vm44_vm1 = vcmask 130048   ;;  %vm129_vm2 = vcmask 523264   ;;  %s395_s1 = inlined_call_operand.vmem [shape: bf16[16,64], index: 1, kind: input, shape index: {}]   ;;  %s396_s0 = inlined_call_operand.vmem [shape: f32[8,16], index: 0, kind: input, shape index: {}]   ;;  %s397_s3 = inlined_call_operand.vmem [shape: bf16[64,32], index: 3, kind: input, shape index: {}]   ;;  %s398_s5 = inlined_call_operand.vmem [shape: bf16[32,3], index: 5, kind: input, shape index: {}]   ;;  %s399_s2 = inlined_call_operand.vmem [shape: f32[1,64], index: 2, kind: input, shape index: {}]   ;;  %s400_s4 = inlined_call_operand.vmem [shape: f32[1,32], index: 4, kind: input, shape index: {}]   ;;  %s401_s6 = inlined_call_operand.vmem [shape: f32[1,3], index: 6, kind: input, shape index: {}]   ;;  %s402_s7 = inlined_call_operand.vmem [shape: f32[8,3], index: 7, kind: output, shape index: {}]  }
   0x1   :  { %278 = vmatprep.subr.bf16.mxu0 %v317_v0  ;;  %v306_v1 = vld [vmem:[%s395_s1] sm:$0xff]   ;;  %280 = vmatprep.mubr.msk.bf16.mxu0 %vm318_vm0, %v317_v0  ;;  %v308_v5 = vld [vmem:[%s397_s3 + $0x8] sm:$0xff]   ;;  %v309_v6 = vld [vmem:[%s397_s3 + $0x10] sm:$0xff]   ;;  %vm198_vm3 = vcmask 261120   ;;  %vm248_vm4 = vcmask 23552  }
   0x2   :  { %v27_v2 = vld [vmem:[%s396_s0] sm:$0xff]  ;;  %284 = vmatprep.subr.bf16.mxu1 %v317_v0  ;;  %292 = vmatprep.mubr.msk.bf16.mxu1 %vm318_vm0, %v317_v0  ;;  %v310_v7 = vld [vmem:[%s397_s3 + $0x18] sm:$0xff]   ;;  %v312_v17 = vld [vmem:[%s398_s5 + $0x8] sm:$0xff]  }
   0x3   :  { %279 = vmatpush3.bf16.msra.mxu0 %v306_v1  ;;  %v28_v3 = vpack.c.bf16 %v27_v2, %v27_v2  ;;  %v307_v4 = vld [vmem:[%s397_s3] sm:$0xff]  }
   0x4   :  { %296 = vmatprep.subr.bf16.mxu0 %v317_v0  ;;  %285 = vmatpush3.bf16.msra.mxu1 %v307_v4  ;;  %v311_v8 = vld [vmem:[%s398_s5] sm:$0xff]  }
   0x5   :  { %286 = vmatprep.subr.bf16.mxu1 %v317_v0  ;;  %v254_v9 = vld [vmem:[%s399_s2] ss:$0 sm:$0xff] }
   0x6   :  { %281 = vmatmul.mubr.msk.bf16.vlgmr.msra.gmra.mrb[0].mxu0 %vm44_vm1, %v28_v3  ;;  %v257_v18 = vld [vmem:[%s400_s4] ss:$0 sm:$0xff] }
   0x7   :  { %300 = vmatprep.mubr.msk.bf16.mxu0 %vm318_vm0, %v317_v0  ;;  %297 = vmatpush3.bf16.msra.mxu0 %v311_v8  ;;  %v263_v26 = vld [vmem:[%s401_s6] ss:$0 sm:$0xff] }
   0x8   :  { %287 = vmatpush3.bf16.msra.mxu1 %v308_v5  ;;  %298 = vmatprep.subr.bf16.mxu0 %v317_v0 }
   0x9   :  { %288 = vmatprep.subr.bf16.mxu1 %v317_v0 }
   0xb   :  { %299 = vmatpush3.bf16.msra.mxu0 %v312_v17 }
   0xc   :  { %289 = vmatpush3.bf16.msra.mxu1 %v309_v6 }
   0xd   :  { %290 = vmatprep.subr.bf16.mxu1 %v317_v0 }
  0x10   :  { %291 = vmatpush3.bf16.msra.mxu1 %v310_v7 }
  0xd9   :  { %v82_v10 = vpop.f32.mrb[0].mxu0 }
  0xda   :  { %v83_v11 = vadd.f32 %v254_v9, %v82_v10  ;;  %v282_v12 = vpop.f32.mrb[1].mxu0 }
  0xdb   :  { %v85_v13 = vpop.f32.mrb[2].mxu0 }
  0xdc   :  { %v88_v14 = vmax.f32 %v83_v11, 0.0  ;;  %v283_v15 = vpop.f32.mrb[3].mxu0 }
  0xde   :  { %v89_v16 = vpack.c.bf16 %v88_v14, %v88_v14 }
  0xe0   :  { %293 = vmatmul.mubr.msk.bf16.vlgmr.msra.gmra.mrb[0].mxu1 %vm129_vm2, %v89_v16 }
 0x1b3   :  { %v167_v19 = vpop.f32.mrb[0].mxu1 }
 0x1b4   :  { %v168_v20 = vadd.f32 %v257_v18, %v167_v19  ;;  %v294_v21 = vpop.f32.mrb[1].mxu1 }
 0x1b5   :  { %v170_v22 = vpop.f32.mrb[2].mxu1 }
 0x1b6   :  { %v173_v23 = vmax.f32 %v168_v20, 0.0  ;;  %v295_v24 = vpop.f32.mrb[3].mxu1 }
 0x1b8   :  { %v174_v25 = vpack.c.bf16 %v173_v23, %v173_v23 }
 0x1ba   :  { %301 = vmatmul.mubr.msk.bf16.vlgmr.msra.gmra.mrb[4].mxu0 %vm198_vm3, %v174_v25 }
 0x28d   :  { %v236_v27 = vpop.f32.mrb[4].mxu0 }
 0x28e   :  { %v237_v28 = vadd.f32 %v263_v26, %v236_v27  ;;  %v302_v29 = vpop.f32.mrb[5].mxu0 }
 0x28f   :  { %v239_v30 = vpop.f32.mrb[6].mxu0 }
 0x290   :  { %v267_v31 = vmul.f32 -1.442695, %v237_v28  ;;  %v303_v32 = vpop.f32.mrb[7].mxu0 }
 0x292   :  { %313 = vpow2.f32 %v267_v31 }
 0x29c   :  { %v314_v33 = vpop.eup %313 }
 0x29d   :  { %v245_v34 = vadd.f32 1.0, %v314_v33 }
 0x29f   :  { %315 = vrcp.f32 %v245_v34 }
 0x2a9   :  { %v316_v35 = vpop.eup %315 }
 0x2aa   :  { %249 = vst.msk [vmem:[%s402_s7] sm:$0xff] %vm248_vm4, %v316_v35 }

</bundles_post_ra>
